<compile_context>
chip_gen: v7x
topology: tpu7x:2x2x1
jax: 0.10.0
libtpu: 0.0.40
codegen_flags: <defaults>
</compile_context>

<pallas_src>
import functools

import jax
import jax.numpy as jnp
import numpy as np
from jax import lax
from jax.experimental import pallas as pl
from jax.experimental.pallas import tpu as pltpu

LANE = 128  # lane width; all feature dims in this model are <= 128


def _round_up(x, m):
    return ((x + m - 1) // m) * m


# ------------------------------ fused kernel -------------------------------

def _fused_dlrm_kernel(dense_ref, idx_ref, *refs, n_bot, n_hid, n_tables, d):
    """Whole DLRM forward on one batch tile of TB rows.

    refs layout:
      [bot (W, b)] * n_bot, [table] * n_tables, [top-hidden (W, b)] * n_hid,
      w_last, b_last(SMEM scalar), out_ref
    Weights / tables are bf16 and zero-padded, so padded lanes of every
    activation stay exactly zero; biases are f32; accumulation is f32.
    """
    pos = 0
    bot = [(refs[pos + 2 * i], refs[pos + 2 * i + 1]) for i in range(n_bot)]
    pos += 2 * n_bot
    tables = refs[pos:pos + n_tables]
    pos += n_tables
    hid = [(refs[pos + 2 * i], refs[pos + 2 * i + 1]) for i in range(n_hid)]
    pos += 2 * n_hid
    w_last_ref = refs[pos]
    b_last_ref = refs[pos + 1]
    out_ref = refs[pos + 2]

    TB = dense_ref.shape[0]

    # ---------------- bottom MLP:  x = relu(... relu(x @ W0 + b0) ...) -------
    x = dense_ref[...]                                        # (TB, IN_PAD) f32
    for w_ref, b_ref in bot:
        x = jnp.dot(x.astype(jnp.bfloat16), w_ref[...],
                    preferred_element_type=jnp.float32)
        x = jnp.maximum(x + b_ref[...], 0.0)                  # (TB, LANE) f32
    # x holds the bottom-MLP output in cols [0, d), exact zeros elsewhere.

    # ---------------- embeddings: one-hot @ table on the MXU -----------------
    # TODO(synk): for realistic DLRM table sizes this must become an
    # HBM-resident DMA gather; one-hot matmul is only sane for tiny tables.
    idx = idx_ref[...]                                        # (TB, n_tables) i32
    rows = tables[0].shape[0]                                 # shared padded rows
    row_iota = lax.broadcasted_iota(jnp.int32, (TB, rows), 1)  # built once
    feats = [x]
    for k in range(n_tables):
        one_hot = (row_iota == idx[:, k:k + 1]).astype(jnp.bfloat16)
        feats.append(jnp.dot(one_hot, tables[k][...],
                             preferred_element_type=jnp.float32))  # (TB, LANE)

    # ------------- pairwise dot-product interactions (torch order) -----------
    # TODO(synk): at DLRM-scale nf (~27 tables, 351 pairs) switch to a batched
    # T @ T^T matmul + one static placement matmul; at nf=4 this loop is free.
    nf = len(feats)
    lane_iota = lax.broadcasted_iota(jnp.int32, (TB, LANE), 1)
    z = x                                   # cols [0, d) = x, rest exactly 0
    p = 0
    for i in range(1, nf):
        for j in range(i):
            dot_ij = jnp.sum(feats[i] * feats[j], axis=1, keepdims=True)  # (TB,1)
            z = z + jnp.where(lane_iota == d + p, dot_ij, 0.0)
            p += 1

    # ---------------- top MLP hidden layers (ReLU) ---------------------------
    for w_ref, b_ref in hid:
        z = jnp.dot(z.astype(jnp.bfloat16), w_ref[...],
                    preferred_element_type=jnp.float32)
        z = jnp.maximum(z + b_ref[...], 0.0)

    # ------------ final 1-wide linear + sigmoid, lane-dense output -----------
    # (1, LANE) . (TB, LANE)^T on the MXU -> logits laid out along lanes, so
    # the store is unmasked and sigmoid runs on TB elements instead of TB*128.
    logit = lax.dot_general(w_last_ref[...], z.astype(jnp.bfloat16),
                            dimension_numbers=(((1,), (1,)), ((), ())),
                            preferred_element_type=jnp.float32)   # (1, TB)
    logit = logit + b_last_ref[0, 0]
    out_ref[...] = jax.nn.sigmoid(logit).astype(out_ref.dtype)


# ------------------------- parameter preparation ---------------------------

def _prep_linear(w, b, in_pad, out_pad=LANE):
    """torch-convention (out, in) weight -> zero-padded bf16 (in_pad, out_pad)
    (in, out) matrix plus f32 (1, out_pad) bias.  Done once at build time."""
    m, n = np.asarray(w).shape
    assert n <= in_pad and m <= out_pad
    wt = np.zeros((in_pad, out_pad), np.float32)
    wt[:n, :m] = np.asarray(w).T
    bb = np.zeros((1, out_pad), np.float32)
    bb[0, :m] = np.asarray(b)
    return jnp.asarray(wt, jnp.bfloat16), jnp.asarray(bb, jnp.float32)


def _prep_last(w, b):
    """Final (1, n) linear -> bf16 (1, LANE) row + f32 (1, 1) scalar bias."""
    m, n = np.asarray(w).shape
    assert m == 1 and n <= LANE
    wr = np.zeros((1, LANE), np.float32)
    wr[0, :n] = np.asarray(w)[0]
    bb = np.asarray(b, np.float32).reshape(1, 1)
    return jnp.asarray(wr, jnp.bfloat16), jnp.asarray(bb, jnp.float32)


def _prep_table(t, rows_pad):
    """(n, d) embedding table -> zero-padded bf16 (rows_pad, LANE)."""
    n, m = np.asarray(t).shape
    assert m <= LANE and n <= rows_pad
    tp = np.zeros((rows_pad, LANE), np.float32)
    tp[:n, :m] = np.asarray(t)
    return jnp.asarray(tp, jnp.bfloat16)


def build_tt_dlrm_forward(bot_params, top_params, emb_tables, d):
    """Prepare lane-dense bf16 parameters once and return forward(dense_x, lS_i)."""
    n_bot, n_top, n_tables = len(bot_params), len(top_params), len(emb_tables)
    n_hid = n_top - 1
    n_in = int(bot_params[0][0].shape[1])
    in_pad = _round_up(n_in, 16)                       # bf16 sublane packing
    rows_pad = _round_up(max(int(t.shape[0]) for t in emb_tables), LANE)
    m_out = int(top_params[-1][0].shape[0])
    nf = 1 + n_tables
    npairs = nf * (nf - 1) // 2
    assert m_out == 1, "top MLP must end in a single sigmoid logit"
    assert int(bot_params[-1][0].shape[0]) == d
    assert d + npairs <= LANE and int(top_params[0][0].shape[1]) == d + npairs

    bot_p = [_prep_linear(w, b, in_pad if i == 0 else LANE)
             for i, (w, b) in enumerate(bot_params)]
    hid_p = [_prep_linear(w, b, LANE) for (w, b) in top_params[:-1]]
    w_last, b_last = _prep_last(*top_params[-1])
    tabs = [_prep_table(t, rows_pad) for t in emb_tables]

    param_ops = []
    for w, b in bot_p:
        param_ops += [w, b]
    param_ops += tabs
    for w, b in hid_p:
        param_ops += [w, b]
    param_ops += [w_last]

    kernel = functools.partial(_fused_dlrm_kernel, n_bot=n_bot, n_hid=n_hid,
                               n_tables=n_tables, d=d)

    def full_spec(a):
        # Grid-invariant parameter block (single block covering the array).
        # TODO(synk): with many/large tables add pipeline_mode=pl.Buffered(1)
        # here to drop the redundant second buffer of invariant params.
        return pl.BlockSpec(a.shape, lambda i: (0,) * a.ndim)

    smem_spec = pl.BlockSpec(memory_space=pltpu.MemorySpace.SMEM)

    param_bytes = sum(int(np.prod(a.shape)) * a.dtype.itemsize for a in param_ops)

    def forward(dense_x, lS_i):
        B = dense_x.shape[0]
        # 256-row tiles fill the 256-wide MXU on v6e/v7x and amortize per-step
        # overhead; batch stays a parallel grid axis (v7x megacore sharding).
        TB = min(_round_up(B, 8), 256)
        B_pad = _round_up(B, TB)
        grid = (B_pad // TB,)

        dense_p = jnp.pad(dense_x.astype(jnp.float32),
                          ((0, B_pad - B), (0, in_pad - n_in)))
        idx = jnp.pad(jnp.stack(lS_i, axis=1).astype(jnp.int32),
                      ((0, B_pad - B), (0, 0)))            # (B_pad, n_tables)

        in_specs = ([pl.BlockSpec((TB, in_pad), lambda i: (i, 0)),
                     pl.BlockSpec((TB, n_tables), lambda i: (i, 0))]
                    + [full_spec(a) for a in param_ops]
                    + [smem_spec])
        out_spec = pl.BlockSpec((None, 1, TB), lambda i: (i, 0, 0))

        flops = 2 * B_pad * (in_pad * LANE + (n_bot - 1) * LANE * LANE
                             + n_tables * rows_pad * LANE
                             + npairs * LANE
                             + n_hid * LANE * LANE + LANE)
        bytes_accessed = int(dense_p.size * 4 + idx.size * 4 + B_pad * 4
                             + param_bytes + 4)

        out = pl.pallas_call(
            kernel,
            out_shape=jax.ShapeDtypeStruct((grid[0], 1, TB), jnp.float32),
            grid=grid,
            in_specs=in_specs,
            out_specs=out_spec,
            compiler_params=pltpu.CompilerParams(
                dimension_semantics=("parallel",),
                vmem_limit_bytes=32 * 1024 * 1024),
            cost_estimate=pl.CostEstimate(flops=int(flops),
                                          transcendentals=int(B_pad),
                                          bytes_accessed=bytes_accessed),
        )(dense_p, idx, *param_ops, b_last)
        return out.reshape(B_pad, 1)[:B]

    return jax.jit(forward)


# --------------------------- parameter creation ----------------------------

def init_mlp_params(key, ln):
    params = []
    for i in range(len(ln) - 1):
        n, m = int(ln[i]), int(ln[i + 1])
        key, kw, kb = jax.random.split(key, 3)
        W = jax.random.normal(kw, (m, n), jnp.float32) * np.sqrt(2.0 / (m + n))
        b = jax.random.normal(kb, (m,), jnp.float32) * np.sqrt(1.0 / m)
        params.append((W, b))
    return params, key


def init_emb_params(key, m, ln_emb):
    tables = []
    for n in ln_emb:
        key, kt = jax.random.split(key)
        bound = float(np.sqrt(1.0 / n))
        tables.append(jax.random.uniform(kt, (int(n), m), jnp.float32,
                                         minval=-bound, maxval=bound))
    return tables, key


# ------------------------------ reference ----------------------------------

def reference_forward(dense_x, lS_i, bot_params, top_params, emb_tables):
    x = dense_x
    for (W, b) in bot_params:
        x = jnp.maximum(x @ W.T + b, 0.0)
    ly = [tbl[idx] for tbl, idx in zip(emb_tables, lS_i)]
    T = jnp.stack([x] + ly, axis=1)
    Z = jnp.einsum("bnd,bmd->bnm", T, T)
    nf = T.shape[1]
    pairs = [(i, j) for i in range(nf) for j in range(i)]
    zflat = jnp.stack([Z[:, i, j] for (i, j) in pairs], axis=1)
    z = jnp.concatenate([x, zflat], axis=1)
    for li, (W, b) in enumerate(top_params):
        z = z @ W.T + b
        z = jax.nn.sigmoid(z) if li == len(top_params) - 1 else jnp.maximum(z, 0.0)
    return z


# ----------------------------------- main -----------------------------------

if __name__ == "__main__":
    feature_size = 16                 # embedding dim d
    ln_emb = [60, 80, 100]            # 3 small tables (all < 1e6 -> EmbeddingBag)
    ln_bot = [13, 32, 16]             # bottom MLP ends at d
    nf = 1 + len(ln_emb)
    npairs = nf * (nf - 1) // 2
    ln_top = [feature_size + npairs, 32, 1]
    B = 8

    key = jax.random.PRNGKey(0)
    key, kd = jax.random.split(key)
    dense_x = jax.random.normal(kd, (B, ln_bot[0]), jnp.float32)
    lS_i = []
    for n in ln_emb:
        key, ki = jax.random.split(key)
        lS_i.append(jax.random.randint(ki, (B,), 0, n, jnp.int32))

    key, kp = jax.random.split(key)
    bot_params, kp = init_mlp_params(kp, ln_bot)
    top_params, kp = init_mlp_params(kp, ln_top)
    emb_tables, kp = init_emb_params(kp, feature_size, ln_emb)

    forward = build_tt_dlrm_forward(bot_params, top_params, emb_tables,
                                    d=feature_size)
    out = jax.block_until_ready(forward(dense_x, lS_i))

    ref = reference_forward(dense_x, lS_i, bot_params, top_params, emb_tables)
    # bf16 MXU operands (f32 accumulation) -> loosened tolerance vs f32 reference.
    np.testing.assert_allclose(np.asarray(out), np.asarray(ref),
                               rtol=2e-2, atol=2e-2)
    print("KERNEL_OK")
</pallas_src>

<mosaic_0001>
module attributes {stable_mosaic.version = 11 : i64} {
  func.func @_fused_dlrm_kernel(%arg0: i32, %arg1: memref<8x16xf32, #tpu.memory_space<vmem>>, %arg2: memref<8x3xi32, #tpu.memory_space<vmem>>, %arg3: memref<16x128xbf16, #tpu.memory_space<vmem>>, %arg4: memref<1x128xf32, #tpu.memory_space<vmem>>, %arg5: memref<128x128xbf16, #tpu.memory_space<vmem>>, %arg6: memref<1x128xf32, #tpu.memory_space<vmem>>, %arg7: memref<128x128xbf16, #tpu.memory_space<vmem>>, %arg8: memref<128x128xbf16, #tpu.memory_space<vmem>>, %arg9: memref<128x128xbf16, #tpu.memory_space<vmem>>, %arg10: memref<128x128xbf16, #tpu.memory_space<vmem>>, %arg11: memref<1x128xf32, #tpu.memory_space<vmem>>, %arg12: memref<1x128xbf16, #tpu.memory_space<vmem>>, %arg13: memref<1x1xf32, #tpu.memory_space<smem>>, %arg14: memref<1x1x8xf32, #tpu.memory_space<vmem>>) attributes {dimension_semantics = [#tpu.dimension_semantics<parallel>], iteration_bounds = array<i64: 1>, scalar_prefetch = 0 : i64, scratch_operands = 0 : i64, tpu.core_type = #tpu.core_type<tc>, window_params = [{transform_indices = @transform_0, window_bounds = array<i64: 8, 16>}, {transform_indices = @transform_1, window_bounds = array<i64: 8, 3>}, {pipeline_mode = #tpu.pipeline_mode<synchronous>, transform_indices = @transform_2, window_bounds = array<i64: 16, 128>}, {pipeline_mode = #tpu.pipeline_mode<synchronous>, transform_indices = @transform_3, window_bounds = array<i64: 1, 128>}, {pipeline_mode = #tpu.pipeline_mode<synchronous>, transform_indices = @transform_4, window_bounds = array<i64: 128, 128>}, {pipeline_mode = #tpu.pipeline_mode<synchronous>, transform_indices = @transform_5, window_bounds = array<i64: 1, 128>}, {pipeline_mode = #tpu.pipeline_mode<synchronous>, transform_indices = @transform_6, window_bounds = array<i64: 128, 128>}, {pipeline_mode = #tpu.pipeline_mode<synchronous>, transform_indices = @transform_7, window_bounds = array<i64: 128, 128>}, {pipeline_mode = #tpu.pipeline_mode<synchronous>, transform_indices = @transform_8, window_bounds = array<i64: 128, 128>}, {pipeline_mode = #tpu.pipeline_mode<synchronous>, transform_indices = @transform_9, window_bounds = array<i64: 128, 128>}, {pipeline_mode = #tpu.pipeline_mode<synchronous>, transform_indices = @transform_10, window_bounds = array<i64: 1, 128>}, {pipeline_mode = #tpu.pipeline_mode<synchronous>, transform_indices = @transform_11, window_bounds = array<i64: 1, 128>}, {transform_indices = @transform_12, window_bounds = array<i64: 1, 1>}, {transform_indices = @transform_13, window_bounds = array<i64: 1, 1, 8>}]} {
    %c0 = arith.constant 0 : index
    %c0_0 = arith.constant 0 : index
    %0 = vector.load %arg1[%c0, %c0_0] : memref<8x16xf32, #tpu.memory_space<vmem>>, vector<8x16xf32>
    %1 = arith.truncf %0 : vector<8x16xf32> to vector<8x16xbf16>
    %c0_1 = arith.constant 0 : index
    %c0_2 = arith.constant 0 : index
    %2 = vector.load %arg3[%c0_1, %c0_2] : memref<16x128xbf16, #tpu.memory_space<vmem>>, vector<16x128xbf16>
    %cst = arith.constant dense<0.000000e+00> : vector<8x128xf32>
    %3 = tpu.matmul %1, %2, %cst {dimension_numbers = #tpu.dot_dimension_numbers<[1], [0], [0], [1], [0, 0, 1, 1], [], []>} : vector<8x16xbf16>, vector<16x128xbf16>, vector<8x128xf32> -> vector<8x128xf32>
    %c0_3 = arith.constant 0 : index
    %c0_4 = arith.constant 0 : index
    %4 = vector.load %arg4[%c0_3, %c0_4] : memref<1x128xf32, #tpu.memory_space<vmem>>, vector<1x128xf32>
    %5 = vector.broadcast %4 : vector<1x128xf32> to vector<8x128xf32>
    %6 = arith.addf %3, %5 : vector<8x128xf32>
    %cst_5 = arith.constant 0.000000e+00 : f32
    %7 = vector.broadcast %cst_5 : f32 to vector<8x128xf32>
    %8 = arith.maximumf %6, %7 : vector<8x128xf32>
    %9 = arith.truncf %8 : vector<8x128xf32> to vector<8x128xbf16>
    %c0_6 = arith.constant 0 : index
    %c0_7 = arith.constant 0 : index
    %10 = vector.load %arg5[%c0_6, %c0_7] : memref<128x128xbf16, #tpu.memory_space<vmem>>, vector<128x128xbf16>
    %cst_8 = arith.constant dense<0.000000e+00> : vector<8x128xf32>
    %11 = tpu.matmul %9, %10, %cst_8 {dimension_numbers = #tpu.dot_dimension_numbers<[1], [0], [0], [1], [0, 0, 1, 1], [], []>} : vector<8x128xbf16>, vector<128x128xbf16>, vector<8x128xf32> -> vector<8x128xf32>
    %c0_9 = arith.constant 0 : index
    %c0_10 = arith.constant 0 : index
    %12 = vector.load %arg6[%c0_9, %c0_10] : memref<1x128xf32, #tpu.memory_space<vmem>>, vector<1x128xf32>
    %13 = vector.broadcast %12 : vector<1x128xf32> to vector<8x128xf32>
    %14 = arith.addf %11, %13 : vector<8x128xf32>
    %cst_11 = arith.constant 0.000000e+00 : f32
    %15 = vector.broadcast %cst_11 : f32 to vector<8x128xf32>
    %16 = arith.maximumf %14, %15 : vector<8x128xf32>
    %c0_12 = arith.constant 0 : index
    %c0_13 = arith.constant 0 : index
    %17 = vector.load %arg2[%c0_12, %c0_13] : memref<8x3xi32, #tpu.memory_space<vmem>>, vector<8x3xi32>
    %18 = tpu.iota {dimensions = array<i32: 1>} : vector<8x128xi32>
    %19 = vector.extract_strided_slice %17 {offsets = [0, 0], sizes = [8, 1], strides = [1, 1]} : vector<8x3xi32> to vector<8x1xi32>
    %20 = vector.broadcast %19 : vector<8x1xi32> to vector<8x128xi32>
    %21 = arith.cmpi eq, %18, %20 : vector<8x128xi32>
    %22 = arith.extui %21 : vector<8x128xi1> to vector<8x128xi32>
    %23 = arith.sitofp %22 : vector<8x128xi32> to vector<8x128xf32>
    %24 = arith.truncf %23 : vector<8x128xf32> to vector<8x128xbf16>
    %c0_14 = arith.constant 0 : index
    %c0_15 = arith.constant 0 : index
    %25 = vector.load %arg7[%c0_14, %c0_15] : memref<128x128xbf16, #tpu.memory_space<vmem>>, vector<128x128xbf16>
    %cst_16 = arith.constant dense<0.000000e+00> : vector<8x128xf32>
    %26 = tpu.matmul %24, %25, %cst_16 {dimension_numbers = #tpu.dot_dimension_numbers<[1], [0], [0], [1], [0, 0, 1, 1], [], []>} : vector<8x128xbf16>, vector<128x128xbf16>, vector<8x128xf32> -> vector<8x128xf32>
    %27 = vector.extract_strided_slice %17 {offsets = [0, 1], sizes = [8, 1], strides = [1, 1]} : vector<8x3xi32> to vector<8x1xi32>
    %28 = vector.broadcast %27 : vector<8x1xi32> to vector<8x128xi32>
    %29 = arith.cmpi eq, %18, %28 : vector<8x128xi32>
    %30 = arith.extui %29 : vector<8x128xi1> to vector<8x128xi32>
    %31 = arith.sitofp %30 : vector<8x128xi32> to vector<8x128xf32>
    %32 = arith.truncf %31 : vector<8x128xf32> to vector<8x128xbf16>
    %c0_17 = arith.constant 0 : index
    %c0_18 = arith.constant 0 : index
    %33 = vector.load %arg8[%c0_17, %c0_18] : memref<128x128xbf16, #tpu.memory_space<vmem>>, vector<128x128xbf16>
    %cst_19 = arith.constant dense<0.000000e+00> : vector<8x128xf32>
    %34 = tpu.matmul %32, %33, %cst_19 {dimension_numbers = #tpu.dot_dimension_numbers<[1], [0], [0], [1], [0, 0, 1, 1], [], []>} : vector<8x128xbf16>, vector<128x128xbf16>, vector<8x128xf32> -> vector<8x128xf32>
    %35 = vector.extract_strided_slice %17 {offsets = [0, 2], sizes = [8, 1], strides = [1, 1]} : vector<8x3xi32> to vector<8x1xi32>
    %36 = vector.broadcast %35 : vector<8x1xi32> to vector<8x128xi32>
    %37 = arith.cmpi eq, %18, %36 : vector<8x128xi32>
    %38 = arith.extui %37 : vector<8x128xi1> to vector<8x128xi32>
    %39 = arith.sitofp %38 : vector<8x128xi32> to vector<8x128xf32>
    %40 = arith.truncf %39 : vector<8x128xf32> to vector<8x128xbf16>
    %c0_20 = arith.constant 0 : index
    %c0_21 = arith.constant 0 : index
    %41 = vector.load %arg9[%c0_20, %c0_21] : memref<128x128xbf16, #tpu.memory_space<vmem>>, vector<128x128xbf16>
    %cst_22 = arith.constant dense<0.000000e+00> : vector<8x128xf32>
    %42 = tpu.matmul %40, %41, %cst_22 {dimension_numbers = #tpu.dot_dimension_numbers<[1], [0], [0], [1], [0, 0, 1, 1], [], []>} : vector<8x128xbf16>, vector<128x128xbf16>, vector<8x128xf32> -> vector<8x128xf32>
    %43 = tpu.iota {dimensions = array<i32: 1>} : vector<8x128xi32>
    %44 = arith.mulf %26, %16 : vector<8x128xf32>
    %cst_23 = arith.constant dense<0.000000e+00> : vector<8xf32>
    %45 = vector.multi_reduction <add>, %44, %cst_23 [1] : vector<8x128xf32> to vector<8xf32>
    %46 = vector.shape_cast %45 : vector<8xf32> to vector<8x1xf32>
    %c16_i32 = arith.constant 16 : i32
    %47 = vector.broadcast %c16_i32 : i32 to vector<8x128xi32>
    %48 = arith.cmpi eq, %43, %47 : vector<8x128xi32>
    %cst_24 = arith.constant 0.000000e+00 : f32
    %49 = vector.shape_cast %46 : vector<8x1xf32> to vector<8x1xf32>
    %50 = vector.broadcast %49 : vector<8x1xf32> to vector<8x128xf32>
    %51 = vector.broadcast %cst_24 : f32 to vector<8x128xf32>
    %52 = arith.select %48, %50, %51 : vector<8x128xi1>, vector<8x128xf32>
    %53 = arith.addf %16, %52 : vector<8x128xf32>
    %54 = arith.mulf %34, %16 : vector<8x128xf32>
    %cst_25 = arith.constant dense<0.000000e+00> : vector<8xf32>
    %55 = vector.multi_reduction <add>, %54, %cst_25 [1] : vector<8x128xf32> to vector<8xf32>
    %56 = vector.shape_cast %55 : vector<8xf32> to vector<8x1xf32>
    %c17_i32 = arith.constant 17 : i32
    %57 = vector.broadcast %c17_i32 : i32 to vector<8x128xi32>
    %58 = arith.cmpi eq, %43, %57 : vector<8x128xi32>
    %cst_26 = arith.constant 0.000000e+00 : f32
    %59 = vector.shape_cast %56 : vector<8x1xf32> to vector<8x1xf32>
    %60 = vector.broadcast %59 : vector<8x1xf32> to vector<8x128xf32>
    %61 = vector.broadcast %cst_26 : f32 to vector<8x128xf32>
    %62 = arith.select %58, %60, %61 : vector<8x128xi1>, vector<8x128xf32>
    %63 = arith.addf %53, %62 : vector<8x128xf32>
    %64 = arith.mulf %34, %26 : vector<8x128xf32>
    %cst_27 = arith.constant dense<0.000000e+00> : vector<8xf32>
    %65 = vector.multi_reduction <add>, %64, %cst_27 [1] : vector<8x128xf32> to vector<8xf32>
    %66 = vector.shape_cast %65 : vector<8xf32> to vector<8x1xf32>
    %c18_i32 = arith.constant 18 : i32
    %67 = vector.broadcast %c18_i32 : i32 to vector<8x128xi32>
    %68 = arith.cmpi eq, %43, %67 : vector<8x128xi32>
    %cst_28 = arith.constant 0.000000e+00 : f32
    %69 = vector.shape_cast %66 : vector<8x1xf32> to vector<8x1xf32>
    %70 = vector.broadcast %69 : vector<8x1xf32> to vector<8x128xf32>
    %71 = vector.broadcast %cst_28 : f32 to vector<8x128xf32>
    %72 = arith.select %68, %70, %71 : vector<8x128xi1>, vector<8x128xf32>
    %73 = arith.addf %63, %72 : vector<8x128xf32>
    %74 = arith.mulf %42, %16 : vector<8x128xf32>
    %cst_29 = arith.constant dense<0.000000e+00> : vector<8xf32>
    %75 = vector.multi_reduction <add>, %74, %cst_29 [1] : vector<8x128xf32> to vector<8xf32>
    %76 = vector.shape_cast %75 : vector<8xf32> to vector<8x1xf32>
    %c19_i32 = arith.constant 19 : i32
    %77 = vector.broadcast %c19_i32 : i32 to vector<8x128xi32>
    %78 = arith.cmpi eq, %43, %77 : vector<8x128xi32>
    %cst_30 = arith.constant 0.000000e+00 : f32
    %79 = vector.shape_cast %76 : vector<8x1xf32> to vector<8x1xf32>
    %80 = vector.broadcast %79 : vector<8x1xf32> to vector<8x128xf32>
    %81 = vector.broadcast %cst_30 : f32 to vector<8x128xf32>
    %82 = arith.select %78, %80, %81 : vector<8x128xi1>, vector<8x128xf32>
    %83 = arith.addf %73, %82 : vector<8x128xf32>
    %84 = arith.mulf %42, %26 : vector<8x128xf32>
    %cst_31 = arith.constant dense<0.000000e+00> : vector<8xf32>
    %85 = vector.multi_reduction <add>, %84, %cst_31 [1] : vector<8x128xf32> to vector<8xf32>
    %86 = vector.shape_cast %85 : vector<8xf32> to vector<8x1xf32>
    %c20_i32 = arith.constant 20 : i32
    %87 = vector.broadcast %c20_i32 : i32 to vector<8x128xi32>
    %88 = arith.cmpi eq, %43, %87 : vector<8x128xi32>
    %cst_32 = arith.constant 0.000000e+00 : f32
    %89 = vector.shape_cast %86 : vector<8x1xf32> to vector<8x1xf32>
    %90 = vector.broadcast %89 : vector<8x1xf32> to vector<8x128xf32>
    %91 = vector.broadcast %cst_32 : f32 to vector<8x128xf32>
    %92 = arith.select %88, %90, %91 : vector<8x128xi1>, vector<8x128xf32>
    %93 = arith.addf %83, %92 : vector<8x128xf32>
    %94 = arith.mulf %42, %34 : vector<8x128xf32>
    %cst_33 = arith.constant dense<0.000000e+00> : vector<8xf32>
    %95 = vector.multi_reduction <add>, %94, %cst_33 [1] : vector<8x128xf32> to vector<8xf32>
    %96 = vector.shape_cast %95 : vector<8xf32> to vector<8x1xf32>
    %c21_i32 = arith.constant 21 : i32
    %97 = vector.broadcast %c21_i32 : i32 to vector<8x128xi32>
    %98 = arith.cmpi eq, %43, %97 : vector<8x128xi32>
    %cst_34 = arith.constant 0.000000e+00 : f32
    %99 = vector.shape_cast %96 : vector<8x1xf32> to vector<8x1xf32>
    %100 = vector.broadcast %99 : vector<8x1xf32> to vector<8x128xf32>
    %101 = vector.broadcast %cst_34 : f32 to vector<8x128xf32>
    %102 = arith.select %98, %100, %101 : vector<8x128xi1>, vector<8x128xf32>
    %103 = arith.addf %93, %102 : vector<8x128xf32>
    %104 = arith.truncf %103 : vector<8x128xf32> to vector<8x128xbf16>
    %c0_35 = arith.constant 0 : index
    %c0_36 = arith.constant 0 : index
    %105 = vector.load %arg10[%c0_35, %c0_36] : memref<128x128xbf16, #tpu.memory_space<vmem>>, vector<128x128xbf16>
    %cst_37 = arith.constant dense<0.000000e+00> : vector<8x128xf32>
    %106 = tpu.matmul %104, %105, %cst_37 {dimension_numbers = #tpu.dot_dimension_numbers<[1], [0], [0], [1], [0, 0, 1, 1], [], []>} : vector<8x128xbf16>, vector<128x128xbf16>, vector<8x128xf32> -> vector<8x128xf32>
    %c0_38 = arith.constant 0 : index
    %c0_39 = arith.constant 0 : index
    %107 = vector.load %arg11[%c0_38, %c0_39] : memref<1x128xf32, #tpu.memory_space<vmem>>, vector<1x128xf32>
    %108 = vector.broadcast %107 : vector<1x128xf32> to vector<8x128xf32>
    %109 = arith.addf %106, %108 : vector<8x128xf32>
    %cst_40 = arith.constant 0.000000e+00 : f32
    %110 = vector.broadcast %cst_40 : f32 to vector<8x128xf32>
    %111 = arith.maximumf %109, %110 : vector<8x128xf32>
    %c0_41 = arith.constant 0 : index
    %c0_42 = arith.constant 0 : index
    %112 = vector.load %arg12[%c0_41, %c0_42] : memref<1x128xbf16, #tpu.memory_space<vmem>>, vector<1x128xbf16>
    %113 = arith.truncf %111 : vector<8x128xf32> to vector<8x128xbf16>
    %cst_43 = arith.constant dense<0.000000e+00> : vector<1x8xf32>
    %114 = tpu.matmul %112, %113, %cst_43 {dimension_numbers = #tpu.dot_dimension_numbers<[1], [1], [0], [0], [0, 0, 1, 0], [], []>} : vector<1x128xbf16>, vector<8x128xbf16>, vector<1x8xf32> -> vector<1x8xf32>
    %c0_44 = arith.constant 0 : index
    %c0_45 = arith.constant 0 : index
    %115 = memref.load %arg13[%c0_44, %c0_45] : memref<1x1xf32, #tpu.memory_space<smem>>
    %116 = vector.broadcast %115 : f32 to vector<1x8xf32>
    %117 = arith.addf %114, %116 : vector<1x8xf32>
    %118 = arith.negf %117 : vector<1x8xf32>
    %119 = math.exp %118 : vector<1x8xf32>
    %cst_46 = arith.constant 1.000000e+00 : f32
    %120 = vector.broadcast %cst_46 : f32 to vector<1x8xf32>
    %121 = arith.addf %120, %119 : vector<1x8xf32>
    %122 = arith.divf %120, %121 : vector<1x8xf32>
    %c0_47 = arith.constant 0 : index
    %c0_48 = arith.constant 0 : index
    %c0_49 = arith.constant 0 : index
    %123 = vector.load %arg14[%c0_47, %c0_48, %c0_49] : memref<1x1x8xf32, #tpu.memory_space<vmem>>, vector<1x1x8xf32>
    %124 = vector.shape_cast %123 : vector<1x1x8xf32> to vector<1x8xf32>
    %125 = vector.shape_cast %122 : vector<1x8xf32> to vector<1x1x8xf32>
    tpu.vector_store %arg14[%c0_47, %c0_48, %c0_49], %125 {strides = array<i32>} : memref<1x1x8xf32, #tpu.memory_space<vmem>>, vector<1x1x8xf32>,
    return
  }
  func.func @transform_0(%arg0: i32) -> (i32, i32) {
    %c0_i32 = arith.constant 0 : i32
    %c0_i32_0 = arith.constant 0 : i32
    return %arg0, %c0_i32 : i32, i32
  }
  func.func @transform_1(%arg0: i32) -> (i32, i32) {
    %c0_i32 = arith.constant 0 : i32
    %c0_i32_0 = arith.constant 0 : i32
    return %arg0, %c0_i32 : i32, i32
  }
  func.func @transform_2(%arg0: i32) -> (i32, i32) {
    %c0_i32 = arith.constant 0 : i32
    %c0_i32_0 = arith.constant 0 : i32
    %c0_i32_1 = arith.constant 0 : i32
    return %c0_i32, %c0_i32_0 : i32, i32
  }
  func.func @transform_3(%arg0: i32) -> (i32, i32) {
    %c0_i32 = arith.constant 0 : i32
    %c0_i32_0 = arith.constant 0 : i32
    %c0_i32_1 = arith.constant 0 : i32
    return %c0_i32, %c0_i32_0 : i32, i32
  }
  func.func @transform_4(%arg0: i32) -> (i32, i32) {
    %c0_i32 = arith.constant 0 : i32
    %c0_i32_0 = arith.constant 0 : i32
    %c0_i32_1 = arith.constant 0 : i32
    return %c0_i32, %c0_i32_0 : i32, i32
  }
  func.func @transform_5(%arg0: i32) -> (i32, i32) {
    %c0_i32 = arith.constant 0 : i32
    %c0_i32_0 = arith.constant 0 : i32
    %c0_i32_1 = arith.constant 0 : i32
    return %c0_i32, %c0_i32_0 : i32, i32
  }
  func.func @transform_6(%arg0: i32) -> (i32, i32) {
    %c0_i32 = arith.constant 0 : i32
    %c0_i32_0 = arith.constant 0 : i32
    %c0_i32_1 = arith.constant 0 : i32
    return %c0_i32, %c0_i32_0 : i32, i32
  }
  func.func @transform_7(%arg0: i32) -> (i32, i32) {
    %c0_i32 = arith.constant 0 : i32
    %c0_i32_0 = arith.constant 0 : i32
    %c0_i32_1 = arith.constant 0 : i32
    return %c0_i32, %c0_i32_0 : i32, i32
  }
  func.func @transform_8(%arg0: i32) -> (i32, i32) {
    %c0_i32 = arith.constant 0 : i32
    %c0_i32_0 = arith.constant 0 : i32
    %c0_i32_1 = arith.constant 0 : i32
    return %c0_i32, %c0_i32_0 : i32, i32
  }
  func.func @transform_9(%arg0: i32) -> (i32, i32) {
    %c0_i32 = arith.constant 0 : i32
    %c0_i32_0 = arith.constant 0 : i32
    %c0_i32_1 = arith.constant 0 : i32
    return %c0_i32, %c0_i32_0 : i32, i32
  }
  func.func @transform_10(%arg0: i32) -> (i32, i32) {
    %c0_i32 = arith.constant 0 : i32
    %c0_i32_0 = arith.constant 0 : i32
    %c0_i32_1 = arith.constant 0 : i32
    return %c0_i32, %c0_i32_0 : i32, i32
  }
  func.func @transform_11(%arg0: i32) -> (i32, i32) {
    %c0_i32 = arith.constant 0 : i32
    %c0_i32_0 = arith.constant 0 : i32
    %c0_i32_1 = arith.constant 0 : i32
    return %c0_i32, %c0_i32_0 : i32, i32
  }
  func.func @transform_12(%arg0: i32) -> (i32, i32) {
    %c0_i32 = arith.constant 0 : i32
    %c0_i32_0 = arith.constant 0 : i32
    %c0_i32_1 = arith.constant 0 : i32
    return %c0_i32, %c0_i32_0 : i32, i32
  }
  func.func @transform_13(%arg0: i32) -> (i32, i32, i32) {
    %c0_i32 = arith.constant 0 : i32
    %c0_i32_0 = arith.constant 0 : i32
    %c0_i32_1 = arith.constant 0 : i32
    return %arg0, %c0_i32, %c0_i32_0 : i32, i32, i32
  }
}

</mosaic_0001>

<bundles_post_ra>
// kernel: forward.1
= control target key start
LH: loop header
LB: loop body
LE: loop exit
PB: predicated region body
PF: predicated region fallthrough
CT: control target
= control target key end

     0   :  { %19 = vsyncpa [#allocation4], 0  ;;  %s1608_s0 = inlined_call_operand.vmem [shape: f32[8,16], index: 0, kind: input, shape index: {}]   ;;  %s1609_s1 = inlined_call_operand.vmem [shape: s32[8,3], index: 1, kind: input, shape index: {}]   ;;  %s1610_s2 = inlined_call_operand.vmem [shape: bf16[16,128], index: 2, kind: input, shape index: {}]   ;;  %s1611_s3 = inlined_call_operand.vmem [shape: f32[1,128], index: 3, kind: input, shape index: {}]   ;;  %s1612_s4 = inlined_call_operand.vmem [shape: bf16[128,128], index: 4, kind: input, shape index: {}]   ;;  %s1613_s5 = inlined_call_operand.hbm [shape: f32[1,128], index: 5, kind: input, shape index: {}]   ;;  %s1614_s6 = inlined_call_operand.vmem [shape: bf16[128,128], index: 6, kind: input, shape index: {}]   ;;  %s1615_s7 = inlined_call_operand.hbm [shape: bf16[128,128], index: 7, kind: input, shape index: {}]   ;;  %s1616_s8 = inlined_call_operand.hbm [shape: bf16[128,128], index: 8, kind: input, shape index: {}]   ;;  %s1617_s9 = inlined_call_operand.hbm [shape: bf16[128,128], index: 9, kind: input, shape index: {}]   ;;  %s1618_s10 = inlined_call_operand.hbm [shape: f32[1,128], index: 10, kind: input, shape index: {}]   ;;  %s1619_s11 = inlined_call_operand.hbm [shape: bf16[1,128], index: 11, kind: input, shape index: {}]   ;;  %s1620_s12 = inlined_call_operand.<no memory space> [shape: f32[1,1], index: 12, kind: input, shape index: {}]   ;;  %s1621_s13 = inlined_call_operand.hbm [shape: f32[1,1,8], index: 13, kind: output, shape index: {}]  }
   0x1   :  { %20 = vsyncpa [#allocation7], 0 }
   0x2   :  { %21 = vsyncpa [#allocation10], 0 }
   0x3   :  { %22 = vsyncpa [#allocation13], 0 }
   0x4   :  { %23 = vsyncpa [#allocation5], 0  ;;  %s1297_s25 = smov [#allocation6]   ;;  %s1133_s29 = scalar_lea.hbm %s1615_s7, 1024 }
   0x5   :  { %s51_s26 = sshll.u32 %s1297_s25, 4  ;;  %p1134_p0 = scmp.ne.s32.totalorder %s1615_s7, %s1133_s29  ;;  %s52_s26 = int_to_ptr.vmem [resolvable:$true] %s51_s26 }
   0x6   :  { %p1137_p1 = scmp.lt.u32.totalorder %s1133_s29, %s1615_s7 }
   0x8   :  { %p1139_p2 = pnand %p1137_p1, %p1134_p0 }
   0xa   :  { %1142 = shalt.err (!%p1139_p2)
}
   0xb   :  { %s1143_s17 = scalar_lea.vmem %s52_s26, 1024  ;;  %p1148_p4 = scmp.lt.s32.totalorder %s52_s26, %s52_s26 }
   0xc   :  { %p1144_p3 = scmp.ne.s32.totalorder %s52_s26, %s1143_s17  ;;  %p1149_p5 = scmp.lt.s32.totalorder %s1143_s17, %s1143_s17 }
   0xe   :  { %p1150_p6 = por %p1149_p5, %p1148_p4 }
  0x10   :  { %p1151_p7 = pnand %p1150_p6, %p1144_p3 }
  0x12   :  { %1154 = shalt.err (!%p1151_p7)
}
  0x13   :  { %s1298_s18 = smov 64   ;;  %s1299_s19 = smov 4  }
  0x14   :  { %57 = dma.hbm_to_vmem [thread:$0]  %s1615_s7, 1024, %s52_s26, [#allocation7], %s1298_s18, %s1298_s18, %s1299_s19  }
  0x15   :  { %s1300_s22 = smov [#allocation9]   ;;  %s1301_s24 = smov [#allocation3]  }
  0x16   :  { %s75_s23 = sshll.u32 %s1300_s22, 4  ;;  %s40_s25 = sshll.u32 %s1301_s24, 4  ;;  %s76_s23 = int_to_ptr.vmem [resolvable:$true] %s75_s23  ;;  %s41_s25 = int_to_ptr.vmem [resolvable:$true] %s40_s25 }
  0x17   :  { %s1155_s29 = scalar_lea.hbm %s1617_s9, 1024 }
  0x18   :  { %p1156_p8 = scmp.ne.s32.totalorder %s1617_s9, %s1155_s29  ;;  %p1159_p9 = scmp.lt.u32.totalorder %s1155_s29, %s1617_s9 }
  0x1a   :  { %p1161_p10 = pnand %p1159_p9, %p1156_p8 }
  0x1c   :  { %1164 = shalt.err (!%p1161_p10)
}
  0x1d   :  { %s1165_s7 = scalar_lea.vmem %s76_s23, 1024  ;;  %p1170_p12 = scmp.lt.s32.totalorder %s76_s23, %s76_s23 }
  0x1e   :  { %p1166_p11 = scmp.ne.s32.totalorder %s76_s23, %s1165_s7  ;;  %p1171_p13 = scmp.lt.s32.totalorder %s1165_s7, %s1165_s7 }
  0x20   :  { %p1172_p0 = por %p1171_p13, %p1170_p12 }
  0x22   :  { %p1173_p1 = pnand %p1172_p0, %p1166_p11 }
  0x24   :  { %1176 = shalt.err (!%p1173_p1)
}
  0x25   :  { %81 = dma.hbm_to_vmem [thread:$0]  %s1617_s9, 1024, %s76_s23, [#allocation10], %s1298_s18, %s1298_s18, %s1299_s19  }
  0x26   :  { %s1177_s22 = scalar_lea.hbm %s1613_s5, 16 }
  0x27   :  { %p1178_p2 = scmp.ne.s32.totalorder %s1613_s5, %s1177_s22  ;;  %p1181_p3 = scmp.lt.u32.totalorder %s1177_s22, %s1613_s5 }
  0x29   :  { %p1183_p4 = pnand %p1181_p3, %p1178_p2 }
  0x2b   :  { %1186 = shalt.err (!%p1183_p4)
}
  0x2c   :  { %s1187_s30 = scalar_lea.vmem %s41_s25, 16  ;;  %s1191_s14 = scalar_lea.vmem %s41_s25, 32 }
  0x2d   :  { %p1188_p5 = scmp.ne.s32.totalorder %s41_s25, %s1187_s30  ;;  %p1192_p6 = scmp.lt.s32.totalorder %s41_s25, %s41_s25 }
  0x2e   :  { %p1193_p7 = scmp.lt.s32.totalorder %s1191_s14, %s1187_s30 }
  0x30   :  { %p1194_p8 = por %p1193_p7, %p1192_p6 }
  0x32   :  { %p1195_p9 = pnand %p1194_p8, %p1188_p5 }
  0x34   :  { %1198 = shalt.err (!%p1195_p9)
}
  0x35   :  { %43 = dma.hbm_to_vmem [thread:$0]  %s1613_s5, 16, %s41_s25, [#allocation4]  }
  0x36   :  { %s1302_s15 = smov [#allocation8]   ;;  %s1303_s7 = smov [#allocation11]  }
  0x37   :  { %s63_s16 = sshll.u32 %s1302_s15, 4  ;;  %s88_s26 = sshll.u32 %s1303_s7, 4  ;;  %s64_s16 = int_to_ptr.vmem [resolvable:$true] %s63_s16  ;;  %s89_s26 = int_to_ptr.vmem [resolvable:$true] %s88_s26 }
  0x38   :  { %s1199_s21 = scalar_lea.hbm %s1616_s8, 1024 }
  0x39   :  { %p1200_p10 = scmp.ne.s32.totalorder %s1616_s8, %s1199_s21  ;;  %p1203_p11 = scmp.lt.u32.totalorder %s1199_s21, %s1616_s8 }
  0x3b   :  { %p1205_p12 = pnand %p1203_p11, %p1200_p10 }
  0x3d   :  { %1208 = shalt.err (!%p1205_p12)
}
  0x3e   :  { %s1209_s5 = scalar_lea.vmem %s64_s16, 1024  ;;  %p1214_p0 = scmp.lt.s32.totalorder %s64_s16, %s64_s16 }
  0x3f   :  { %p1210_p13 = scmp.ne.s32.totalorder %s64_s16, %s1209_s5  ;;  %p1215_p1 = scmp.lt.s32.totalorder %s1209_s5, %s1209_s5 }
  0x41   :  { %p1216_p2 = por %p1215_p1, %p1214_p0 }
  0x43   :  { %p1217_p3 = pnand %p1216_p2, %p1210_p13 }
  0x45   :  { %1220 = shalt.err (!%p1217_p3)
}
  0x46   :  { %69 = dma.hbm_to_vmem [thread:$0]  %s1616_s8, 1024, %s64_s16, [#allocation7], %s1298_s18, %s1298_s18, %s1299_s19  }
  0x47   :  { %s1221_s9 = scalar_lea.hbm %s1618_s10, 16 }
  0x48   :  { %p1222_p4 = scmp.ne.s32.totalorder %s1618_s10, %s1221_s9  ;;  %p1225_p5 = scmp.lt.u32.totalorder %s1221_s9, %s1618_s10 }
  0x4a   :  { %p1227_p6 = pnand %p1225_p5, %p1222_p4 }
  0x4c   :  { %1230 = shalt.err (!%p1227_p6)
}
  0x4d   :  { %s1231_s20 = scalar_lea.vmem %s89_s26, 16  ;;  %s1235_s21 = scalar_lea.vmem %s89_s26, 32 }
  0x4e   :  { %p1232_p7 = scmp.ne.s32.totalorder %s89_s26, %s1231_s20  ;;  %p1236_p8 = scmp.lt.s32.totalorder %s89_s26, %s89_s26 }
  0x4f   :  { %p1237_p9 = scmp.lt.s32.totalorder %s1235_s21, %s1231_s20 }
  0x51   :  { %p1238_p10 = por %p1237_p9, %p1236_p8 }
  0x53   :  { %p1239_p11 = pnand %p1238_p10, %p1232_p7 }
  0x55   :  { %1242 = shalt.err (!%p1239_p11)
}
  0x56   :  { %91 = dma.hbm_to_vmem [thread:$0]  %s1618_s10, 16, %s89_s26, [#allocation10]  }
  0x57   :  { %s1304_s19 = smov [#allocation12]   ;;  %s1243_s27 = scalar_lea.hbm %s1619_s11, 16 }
  0x58   :  { %s98_s16 = sshll.u32 %s1304_s19, 4  ;;  %p1244_p12 = scmp.ne.s32.totalorder %s1619_s11, %s1243_s27  ;;  %s99_s16 = int_to_ptr.vmem [resolvable:$true] %s98_s16 }
  0x59   :  { %p1247_p13 = scmp.lt.u32.totalorder %s1243_s27, %s1619_s11 }
  0x5b   :  { %p1249_p0 = pnand %p1247_p13, %p1244_p12 }
  0x5d   :  { %1252 = shalt.err (!%p1249_p0)
}
  0x5e   :  { %s1253_s30 = scalar_lea.vmem %s99_s16, 16  ;;  %s1257_s10 = scalar_lea.vmem %s99_s16, 32 }
  0x5f   :  { %p1254_p1 = scmp.ne.s32.totalorder %s99_s16, %s1253_s30  ;;  %p1258_p2 = scmp.lt.s32.totalorder %s99_s16, %s99_s16 }
  0x60   :  { %p1259_p3 = scmp.lt.s32.totalorder %s1257_s10, %s1253_s30 }
  0x62   :  { %p1260_p4 = por %p1259_p3, %p1258_p2 }
  0x64   :  { %p1261_p5 = pnand %p1260_p4, %p1254_p1 }
  0x66   :  { %1264 = shalt.err (!%p1261_p5)
}
  0x67   :  { %101 = dma.hbm_to_vmem [thread:$0]  %s1619_s11, 16, %s99_s16, [#allocation13]  }
  0x68   :  { %1287 = dma.done.wait [#allocation4], 16  }
  0x69   :  { %1288 = vsyncadd [#allocation4], 4294967280 }
  0x6a   :  { %1289 = dma.done.wait [#allocation7], 2048  }
  0x6b   :  { %1290 = vsyncadd [#allocation7], 4294965248 }
  0x6c   :  { %1291 = dma.done.wait [#allocation10], 1040  }
  0x6d   :  { %1292 = vsyncadd [#allocation10], 4294966256 }
  0x6e   :  { %1293 = dma.done.wait [#allocation13], 16  }
  0x6f   :  { %1294 = vsyncadd [#allocation13], 4294967280  ;;  %v1305_v0 = vmov 0.0   ;;  %vm1306_vm0 = vmmov 0   ;;  %v1307_v1 = vmov 0   ;;  %v1308_v2 = vmov 2  }
  0x70   :  { %957 = vmatprep.subr.bf16.mxu0 %v1305_v0  ;;  %959 = vmatprep.mubr.msk.bf16.mxu0 %vm1306_vm0, %v1305_v0  ;;  %v1088_v3 = vld [vmem:[%s1610_s2] sm:$0xff]   ;;  %vm140_vm1 = vcmask 130048   ;;  %v1309_v8 = vmov 1   ;;  %v1090_v9 = vld [vmem:[%s1614_s6 + $0x8] sm:$0xff]   ;;  %v1091_v11 = vld [vmem:[%s1614_s6 + $0x10] sm:$0xff]   ;;  %v299_v24 = vlaneseq  ;;  %s1311_s19 = smov [#allocation14]  }
  0x71   :  { %1084 = vset.pattern.permute.xlu0 %v1307_v1  ;;  %1086 = vset.pattern.permute.xlu1 %v1308_v2  ;;  %v123_v4 = vld [vmem:[%s1608_s0] sm:$0xff]  ;;  %v1098_v12 = vld [vmem:[%s1612_s4 + $0x8] sm:$0xff]   ;;  %v1092_v13 = vld [vmem:[%s1614_s6 + $0x18] sm:$0xff]   ;;  %v1310_v28 = vmov 1.0|1.0   ;;  %s841_s16 = sshll.u32 %s1311_s19, 4  ;;  %s842_s16 = int_to_ptr.vmem [resolvable:$true] %s841_s16 }
  0x72   :  { %963 = vmatprep.subr.bf16.mxu1 %v1305_v0  ;;  %979 = vmatprep.mubr.msk.bf16.mxu1 %vm1306_vm0, %v1305_v0  ;;  %v298_v5 = vld [vmem:[%s1609_s1] sm:$0xff]  ;;  %v124_v6 = vpack.c.bf16 %v123_v4, %v123_v4  ;;  %v1100_v14 = vld [vmem:[%s1612_s4 + $0x10] sm:$0xff]   ;;  %v1102_v16 = vld [vmem:[%s1612_s4 + $0x18] sm:$0xff]   ;;  %v1545_v25 = vand.u32 127, %v299_v24  ;;  %vm833_vm14 = vcmask 57344   ;;  %s1265_s22 = scalar_lea.vmem %s842_s16, 16  ;;  %p1270_p7 = scmp.lt.s32.totalorder %s842_s16, %s842_s16 }
  0x73   :  { %958 = vmatpush3.bf16.msra.mxu0 %v1088_v3  ;;  %302 = vperm.xlu0 %1084, %v298_v5   ;;  %v1089_v7 = vld [vmem:[%s1614_s6] sm:$0xff]   ;;  %v1094_v17 = vld [vmem:[%s1614_s6 + $0x28] sm:$0xff]   ;;  %v1095_v19 = vld [vmem:[%s1614_s6 + $0x30] sm:$0xff]   ;;  %p1266_p6 = scmp.ne.s32.totalorder %s842_s16, %s1265_s22  ;;  %s1269_s24 = scalar_lea.vmem %s842_s16, 32 }
  0x74   :  { %524 = vperm.xlu1 %1086, %v298_v5   ;;  %983 = vmatprep.subr.bf16.mxu0 %v1305_v0  ;;  %v1096_v10 = vld [vmem:[%s1612_s4] sm:$0xff]   ;;  %v1106_v20 = vld [vmem:[%s1612_s4 + $0x28] sm:$0xff]   ;;  %v1097_v21 = vld [vmem:[%s1614_s6 + $0x38] sm:$0xff]   ;;  %vm637_vm8 = vcmp.eq.s32.totalorder %v1545_v25, 16  ;;  %vm643_vm9 = vcmp.eq.s32.totalorder %v1545_v25, 17  ;;  %vm649_vm10 = vcmp.eq.s32.totalorder %v1545_v25, 18  ;;  %p1271_p8 = scmp.lt.s32.totalorder %s1269_s24, %s1265_s22 }
  0x75   :  { %964 = vmatpush3.bf16.msra.mxu1 %v1096_v10  ;;  %v1093_v15 = vld [vmem:[%s1614_s6 + $0x20] sm:$0xff]   ;;  %v1108_v22 = vld [vmem:[%s1612_s4 + $0x30] sm:$0xff]   ;;  %v1110_v23 = vld [vmem:[%s1612_s4 + $0x38] sm:$0xff]   ;;  %vm655_vm11 = vcmp.eq.s32.totalorder %v1545_v25, 19  ;;  %vm661_vm12 = vcmp.eq.s32.totalorder %v1545_v25, 20  ;;  %vm667_vm13 = vcmp.eq.s32.totalorder %v1545_v25, 21 }
  0x76   :  { %960 = vmatmul.mubr.msk.bf16.vlgmr.msra.gmra.mrb[0].mxu0 %vm140_vm1, %v124_v6  ;;  %965 = vmatprep.subr.bf16.mxu1 %v1305_v0  ;;  %v1104_v18 = vld [vmem:[%s1612_s4 + $0x20] sm:$0xff]   ;;  %v1101_v29 = vld [vmem:[#allocation8 + $0x8] sm:$0xff]   ;;  %v1103_v30 = vld [vmem:[#allocation8 + $0x10] sm:$0xff]   ;;  %p1272_p9 = por %p1271_p8, %p1270_p7 }
  0x77   :  { %1085 = vset.pattern.permute.xlu0 %v1309_v8  ;;  %984 = vmatpush3.bf16.msra.mxu0 %v1089_v7  ;;  %v1099_v27 = vld [vmem:[#allocation8] sm:$0xff]   ;;  %v1105_v31 = vld [vmem:[#allocation8 + $0x18] sm:$0xff]   ;;  %v1109_v33 = vld [vmem:[#allocation8 + $0x28] sm:$0xff]  }
  0x78   :  { %413 = vperm.xlu0 %1085, %v298_v5   ;;  %985 = vmatprep.subr.bf16.mxu0 %v1305_v0  ;;  %v1107_v32 = vld [vmem:[#allocation8 + $0x20] sm:$0xff]   ;;  %v1111_v34 = vld [vmem:[#allocation8 + $0x30] sm:$0xff]   ;;  %v1113_v36 = vld [vmem:[#allocation8 + $0x38] sm:$0xff]   ;;  %p1273_p10 = pnand %p1272_p9, %p1266_p6 }
  0x79   :  { %999 = vmatprep.mubr.msk.bf16.mxu0 %vm1306_vm0, %v1305_v0  ;;  %966 = vmatpush3.bf16.msra.mxu1 %v1098_v12  ;;  %v853_v37 = vld [vmem:[%s1611_s3] ss:$0 sm:$0xff]  ;;  %v1112_v44 = vld [vmem:[#allocation6] sm:$0xff]   ;;  %v1114_v46 = vld [vmem:[#allocation6 + $0x8] sm:$0xff]  }
  0x7a   :  { %967 = vmatprep.subr.bf16.mxu1 %v1305_v0  ;;  %v1115_v47 = vld [vmem:[#allocation6 + $0x10] sm:$0xff]   ;;  %v1116_v48 = vld [vmem:[#allocation6 + $0x18] sm:$0xff]   ;;  %v1117_v49 = vld [vmem:[#allocation6 + $0x20] sm:$0xff]  }
  0x7b   :  { %986 = vmatpush3.bf16.msra.mxu0 %v1090_v9  ;;  %v1118_v50 = vld [vmem:[#allocation6 + $0x28] sm:$0xff]   ;;  %v1119_v51 = vld [vmem:[#allocation6 + $0x30] sm:$0xff]   ;;  %v1120_v53 = vld [vmem:[#allocation6 + $0x38] sm:$0xff]  }
  0x7c   :  { %987 = vmatprep.subr.bf16.mxu0 %v1305_v0  ;;  %1087 = vset.pattern.permute.xlu0 %v1308_v2  ;;  %v856_v63 = vld [vmem:[#allocation3] ss:$0 sm:$0xff]  ;;  %v1121_v8 = vld [vmem:[#allocation9] sm:$0xff]   ;;  %v1122_v9 = vld [vmem:[#allocation9 + $0x8] sm:$0xff]  }
  0x7d   :  { %968 = vmatpush3.bf16.msra.mxu1 %v1100_v14  ;;  %v1123_v10 = vld [vmem:[#allocation9 + $0x10] sm:$0xff]   ;;  %v1124_v12 = vld [vmem:[#allocation9 + $0x18] sm:$0xff]  }
  0x7e   :  { %969 = vmatprep.subr.bf16.mxu1 %v1305_v0 }
  0x7f   :  { %988 = vmatpush3.bf16.msra.mxu0 %v1091_v11 }
  0x80   :  { %989 = vmatprep.subr.bf16.mxu0 %v1305_v0 }
  0x81   :  { %970 = vmatpush3.bf16.msra.mxu1 %v1102_v16 }
  0x82   :  { %971 = vmatprep.subr.bf16.mxu1 %v1305_v0 }
  0x83   :  { %990 = vmatpush3.bf16.msra.mxu0 %v1092_v13 }
  0x84   :  { %991 = vmatprep.subr.bf16.mxu0 %v1305_v0 }
  0x85   :  { %972 = vmatpush3.bf16.msra.mxu1 %v1104_v18 }
  0x86   :  { %973 = vmatprep.subr.bf16.mxu1 %v1305_v0 }
  0x87   :  { %992 = vmatpush3.bf16.msra.mxu0 %v1093_v15 }
  0x88   :  { %993 = vmatprep.subr.bf16.mxu0 %v1305_v0 }
  0x89   :  { %974 = vmatpush3.bf16.msra.mxu1 %v1106_v20 }
  0x8a   :  { %975 = vmatprep.subr.bf16.mxu1 %v1305_v0 }
  0x8b   :  { %994 = vmatpush3.bf16.msra.mxu0 %v1094_v17 }
  0x8c   :  { %995 = vmatprep.subr.bf16.mxu0 %v1305_v0 }
  0x8d   :  { %976 = vmatpush3.bf16.msra.mxu1 %v1108_v22  ;;  %v1127_v22 = vld [vmem:[#allocation9 + $0x30] sm:$0xff]  }
  0x8e   :  { %977 = vmatprep.subr.bf16.mxu1 %v1305_v0 }
  0x8f   :  { %996 = vmatpush3.bf16.msra.mxu0 %v1095_v19  ;;  %v1125_v19 = vld [vmem:[#allocation9 + $0x20] sm:$0xff]  }
  0x90   :  { %997 = vmatprep.subr.bf16.mxu0 %v1305_v0 }
  0x91   :  { %978 = vmatpush3.bf16.msra.mxu1 %v1110_v23  ;;  %v1128_v23 = vld [vmem:[#allocation9 + $0x38] sm:$0xff]  }
  0x92   :  { %1003 = vmatprep.subr.bf16.mxu1 %v1305_v0 }
  0x93   :  { %998 = vmatpush3.bf16.msra.mxu0 %v1097_v21  ;;  %v1126_v21 = vld [vmem:[#allocation9 + $0x28] sm:$0xff]  }
  0x94   :  { %1023 = vmatprep.subr.bf16.mxu0 %v1305_v0 }
  0xf2   :  { %v303_v26 = vpop.permute.xlu0 %302 }
  0xf3   :  { %vm304_vm2 = vcmp.eq.s32.totalorder %v1545_v25, %v303_v26  ;;  %v525_v35 = vpop.permute.xlu1 %524 }
  0xf4   :  { %vm874_vm3 = vmpackc.low %vm304_vm2, %vm304_vm2  ;;  %vm526_vm4 = vcmp.eq.s32.totalorder %v1545_v25, %v525_v35 }
  0xf5   :  { %1000 = vmatmul.mubr.msk.bf16.vlgmr.msra.gmra.mrb[4].mxu0 %vm874_vm3, %v1310_v28  ;;  %vm896_vm5 = vmpackc.low %vm526_vm4, %vm526_vm4 }
  0xf6   :  { %1024 = vmatpush3.bf16.msra.mxu0 %v1099_v27  ;;  %1039 = vmatprep.mubr.msk.bf16.mxu0 %vm1306_vm0, %v1305_v0 }
  0xf7   :  { %1025 = vmatprep.subr.bf16.mxu0 %v1305_v0  ;;  %v414_v52 = vpop.permute.xlu0 %413 }
  0xf8   :  { %vm415_vm6 = vcmp.eq.s32.totalorder %v1545_v25, %v414_v52  ;;  %v786_v25 = vstv %s1620_s12 }
  0xf9   :  { %vm885_vm7 = vmpackc.low %vm415_vm6, %vm415_vm6 }
  0xfa   :  { %1026 = vmatpush3.bf16.msra.mxu0 %v1101_v29 }
  0xfb   :  { %1027 = vmatprep.subr.bf16.mxu0 %v1305_v0 }
  0xfe   :  { %1028 = vmatpush3.bf16.msra.mxu0 %v1103_v30 }
  0xff   :  { %1029 = vmatprep.subr.bf16.mxu0 %v1305_v0 }
 0x102   :  { %1030 = vmatpush3.bf16.msra.mxu0 %v1105_v31 }
 0x103   :  { %1031 = vmatprep.subr.bf16.mxu0 %v1305_v0 }
 0x106   :  { %1032 = vmatpush3.bf16.msra.mxu0 %v1107_v32 }
 0x107   :  { %1033 = vmatprep.subr.bf16.mxu0 %v1305_v0 }
 0x10a   :  { %1034 = vmatpush3.bf16.msra.mxu0 %v1109_v33 }
 0x10b   :  { %1035 = vmatprep.subr.bf16.mxu0 %v1305_v0 }
 0x10e   :  { %1036 = vmatpush3.bf16.msra.mxu0 %v1111_v34 }
 0x10f   :  { %1037 = vmatprep.subr.bf16.mxu0 %v1305_v0 }
 0x112   :  { %1038 = vmatpush3.bf16.msra.mxu0 %v1113_v36 }
 0x113   :  { %1063 = vmatprep.subr.bf16.mxu0 %v1305_v0 }
 0x115   :  { %1040 = vmatmul.mubr.msk.bf16.vlgmr.msra.gmra.mrb[8].mxu0 %vm896_vm5, %v1310_v28 }
 0x116   :  { %1065 = vmatprep.mubr.msk.bf16.mxu0 %vm1306_vm0, %v1305_v0 }
 0x149   :  { %v178_v38 = vpop.f32.mrb[0].mxu0 }
 0x14a   :  { %v179_v39 = vadd.f32 %v853_v37, %v178_v38  ;;  %v961_v40 = vpop.f32.mrb[1].mxu0 }
 0x14b   :  { %v181_v41 = vpop.f32.mrb[2].mxu0 }
 0x14c   :  { %v184_v42 = vmax.f32 %v179_v39, 0.0  ;;  %v962_v43 = vpop.f32.mrb[3].mxu0 }
 0x14d   :  { %v898_v43 = vld [vmem:[#allocation11] ss:$0 sm:$0xff] }
 0x14e   :  { %v185_v45 = vpack.c.bf16 %v184_v42, %v184_v42 }
 0x150   :  { %980 = vmatmul.mubr.bf16.vlgmr.msra.gmra.mrb[0].mxu1 %v185_v45 }
 0x151   :  { %1004 = vmatpush3.bf16.msra.mxu1 %v1112_v44  ;;  %1019 = vmatprep.mubr.msk.bf16.mxu1 %vm1306_vm0, %v1305_v0 }
 0x152   :  { %1005 = vmatprep.subr.bf16.mxu1 %v1305_v0 }
 0x155   :  { %1006 = vmatpush3.bf16.msra.mxu1 %v1114_v46 }
 0x156   :  { %1007 = vmatprep.subr.bf16.mxu1 %v1305_v0 }
 0x159   :  { %1008 = vmatpush3.bf16.msra.mxu1 %v1115_v47 }
 0x15a   :  { %1009 = vmatprep.subr.bf16.mxu1 %v1305_v0 }
 0x15d   :  { %1010 = vmatpush3.bf16.msra.mxu1 %v1116_v48 }
 0x15e   :  { %1011 = vmatprep.subr.bf16.mxu1 %v1305_v0 }
 0x161   :  { %1012 = vmatpush3.bf16.msra.mxu1 %v1117_v49 }
 0x162   :  { %1013 = vmatprep.subr.bf16.mxu1 %v1305_v0 }
 0x165   :  { %1014 = vmatpush3.bf16.msra.mxu1 %v1118_v50 }
 0x166   :  { %1015 = vmatprep.subr.bf16.mxu1 %v1305_v0 }
 0x169   :  { %1016 = vmatpush3.bf16.msra.mxu1 %v1119_v51  ;;  %v783_v51 = vld [vmem:[#allocation12] sm:$0x1] }
 0x16a   :  { %1017 = vmatprep.subr.bf16.mxu1 %v1305_v0 }
 0x16d   :  { %1018 = vmatpush3.bf16.msra.mxu1 %v1120_v53 }
 0x16e   :  { %1043 = vmatprep.subr.bf16.mxu1 %v1305_v0 }
 0x170   :  { %1020 = vmatmul.mubr.msk.bf16.vlgmr.msra.gmra.mrb[4].mxu1 %vm885_vm7, %v1310_v28 }
 0x171   :  { %1059 = vmatprep.mubr.msk.bf16.mxu1 %vm1306_vm0, %v1305_v0  ;;  %1044 = vmatpush3.bf16.msra.mxu1 %v1121_v8 }
 0x172   :  { %1045 = vmatprep.subr.bf16.mxu1 %v1305_v0 }
 0x175   :  { %1046 = vmatpush3.bf16.msra.mxu1 %v1122_v9 }
 0x176   :  { %1047 = vmatprep.subr.bf16.mxu1 %v1305_v0 }
 0x179   :  { %1048 = vmatpush3.bf16.msra.mxu1 %v1123_v10 }
 0x17a   :  { %1049 = vmatprep.subr.bf16.mxu1 %v1305_v0 }
 0x17d   :  { %1050 = vmatpush3.bf16.msra.mxu1 %v1124_v12 }
 0x17e   :  { %1051 = vmatprep.subr.bf16.mxu1 %v1305_v0 }
 0x181   :  { %1052 = vmatpush3.bf16.msra.mxu1 %v1125_v19 }
 0x182   :  { %1053 = vmatprep.subr.bf16.mxu1 %v1305_v0 }
 0x185   :  { %1054 = vmatpush3.bf16.msra.mxu1 %v1126_v21 }
 0x186   :  { %1055 = vmatprep.subr.bf16.mxu1 %v1305_v0 }
 0x189   :  { %1056 = vmatpush3.bf16.msra.mxu1 %v1127_v22 }
 0x18a   :  { %1057 = vmatprep.subr.bf16.mxu1 %v1305_v0 }
 0x18d   :  { %1058 = vmatpush3.bf16.msra.mxu1 %v1128_v23 }
 0x1c8   :  { %v406_v54 = vpop.f32.mrb[4].mxu0 }
 0x1c9   :  { %v1001_v55 = vpop.f32.mrb[5].mxu0 }
 0x1ca   :  { %v409_v56 = vpop.f32.mrb[6].mxu0 }
 0x1cb   :  { %v1002_v57 = vpop.f32.mrb[7].mxu0 }
 0x1e8   :  { %v628_v58 = vpop.f32.mrb[8].mxu0 }
 0x1e9   :  { %v1041_v59 = vpop.f32.mrb[9].mxu0  ;;  %v658_v60 = vmul.f32 %v628_v58, %v406_v54 }
 0x1ea   :  { %v631_v61 = vpop.f32.mrb[10].mxu0 }
 0x1eb   :  { %v1042_v62 = vpop.f32.mrb[11].mxu0 }
 0x223   :  { %v291_v1 = vpop.f32.mrb[0].mxu1 }
 0x224   :  { %v292_v2 = vadd.f32 %v856_v63, %v291_v1  ;;  %v981_v3 = vpop.f32.mrb[1].mxu1 }
 0x225   :  { %v294_v4 = vpop.f32.mrb[2].mxu1 }
 0x226   :  { %v297_v5 = vmax.f32 %v292_v2, 0.0  ;;  %v982_v6 = vpop.f32.mrb[3].mxu1 }
 0x228   :  { %v634_v7 = vmul.f32 %v406_v54, %v297_v5  ;;  %v652_v20 = vmul.f32 %v628_v58, %v297_v5 }
 0x22a   :  { %635 = vadd.xlane.f32.xlu1 %v634_v7 }
 0x243   :  { %v517_v11 = vpop.f32.mrb[4].mxu1 }
 0x244   :  { %v1021_v13 = vpop.f32.mrb[5].mxu1  ;;  %v640_v14 = vmul.f32 %v517_v11, %v297_v5  ;;  %v646_v15 = vmul.f32 %v517_v11, %v406_v54  ;;  %v664_v16 = vmul.f32 %v628_v58, %v517_v11 }
 0x245   :  { %v520_v17 = vpop.f32.mrb[6].mxu1 }
 0x246   :  { %641 = vadd.xlane.f32.xlu0 %v640_v14  ;;  %v1022_v18 = vpop.f32.mrb[7].mxu1  ;;  %647 = vadd.xlane.f32.xlu1 %v646_v15 }
 0x24a   :  { %659 = vadd.xlane.f32.xlu1 %v658_v60  ;;  %653 = vadd.xlane.f32.xlu0 %v652_v20 }
 0x24e   :  { %665 = vadd.xlane.f32.xlu0 %v664_v16 }
 0x2b7   :  { %v636_v24 = vpop.xlane.xlu1 %635 }
 0x2b8   :  { %v638_v26 = vsel %vm637_vm8, %v636_v24, 0.0 }
 0x2b9   :  { %v639_v27 = vadd.f32 %v638_v26, %v297_v5 }
 0x2d3   :  { %v642_v28 = vpop.xlane.xlu0 %641  ;;  %v648_v29 = vpop.xlane.xlu1 %647 }
 0x2d4   :  { %v644_v30 = vsel %vm643_vm9, %v642_v28, 0.0  ;;  %v650_v32 = vsel %vm649_vm10, %v648_v29, 0.0 }
 0x2d5   :  { %v645_v31 = vadd.f32 %v644_v30, %v639_v27 }
 0x2d7   :  { %v651_v33 = vadd.f32 %v650_v32, %v645_v31  ;;  %v660_v0 = vpop.xlane.xlu1 %659  ;;  %v654_v34 = vpop.xlane.xlu0 %653 }
 0x2d8   :  { %v656_v35 = vsel %vm655_vm11, %v654_v34, 0.0  ;;  %v662_v37 = vsel %vm661_vm12, %v660_v0, 0.0 }
 0x2d9   :  { %v657_v36 = vadd.f32 %v656_v35, %v651_v33 }
 0x2db   :  { %v663_v38 = vadd.f32 %v662_v37, %v657_v36  ;;  %v666_v39 = vpop.xlane.xlu0 %665 }
 0x2dc   :  { %v668_v40 = vsel %vm667_vm13, %v666_v39, 0.0 }
 0x2dd   :  { %v669_v41 = vadd.f32 %v668_v40, %v663_v38 }
 0x2df   :  { %v670_v42 = vpack.c.bf16 %v669_v41, %v669_v41 }
 0x2e1   :  { %1060 = vmatmul.mubr.bf16.vlgmr.msra.gmra.mrb[8].mxu1 %v670_v42 }
 0x3b4   :  { %v776_v44 = vpop.f32.mrb[8].mxu1 }
 0x3b5   :  { %v777_v45 = vadd.f32 %v898_v43, %v776_v44  ;;  %v1061_v46 = vpop.f32.mrb[9].mxu1 }
 0x3b6   :  { %v779_v47 = vpop.f32.mrb[10].mxu1 }
 0x3b7   :  { %v782_v48 = vmax.f32 %v777_v45, 0.0  ;;  %v1062_v49 = vpop.f32.mrb[11].mxu1 }
 0x3b9   :  { %v784_v50 = vpack.c.bf16 %v782_v48, %v782_v48 }
 0x3bb   :  { %1064 = vmatpush3.bf16.xpose.msra.mxu0 %v784_v50 }
 0x3c2   :  { %1066 = vmatmul.mubr.bf16.vlgmr.msra.gmra.mrb[12].mxu0 %v783_v51 }
 0x495   :  { %v821_v52 = vpop.f32.mrb[12].mxu0 }
 0x496   :  { %v822_v53 = vadd.f32 %v821_v52, %v786_v25  ;;  %v1067_v54 = vpop.f32.mrb[13].mxu0 }
 0x497   :  { %v824_v55 = vpop.f32.mrb[14].mxu0 }
 0x498   :  { %v907_v56 = vmul.f32 -1.442695, %v822_v53  ;;  %v1068_v57 = vpop.f32.mrb[15].mxu0 }
 0x49a   :  { %1129 = vpow2.f32 %v907_v56 }
 0x4a4   :  { %v1130_v58 = vpop.eup %1129 }
 0x4a5   :  { %v830_v59 = vadd.f32 1.0, %v1130_v58 }
 0x4a7   :  { %1131 = vrcp.f32 %v830_v59 }
 0x4b1   :  { %v1132_v60 = vpop.eup %1131 }
 0x4b2   :  { %834 = vst.msk [vmem:[#allocation14] sm:$0x1] %vm833_vm14, %v1132_v60 }
 0x4b3   :  { %1276 = shalt.err (!%p1273_p10)
}
 0x4b4   :  { %s1277_s28 = scalar_lea.hbm %s1621_s13, 16 }
 0x4b5   :  { %p1278_p11 = scmp.ne.s32.totalorder %s1621_s13, %s1277_s28  ;;  %p1281_p12 = scmp.lt.u32.totalorder %s1277_s28, %s1621_s13 }
 0x4b7   :  { %p1283_p13 = pnand %p1281_p12, %p1278_p11 }
 0x4b9   :  { %1286 = shalt.err (!%p1283_p13)
}
 0x4ba   :  { %844 = dma.vmem_to_hbm [thread:$0]  %s842_s16, 16, %s1621_s13, [#allocation5]  }
 0x4bb   :  { %1295 = dma.done.wait [#allocation5], 16  }
 0x4bc   :  { %1296 = vsyncadd [#allocation5], 4294967280 }
 0x4bd   :  { %848 = vsyncpa [#allocation4], 1 }
 0x4be   :  { %849 = vsyncpa [#allocation7], 1 }
 0x4bf   :  { %850 = vsyncpa [#allocation10], 1 }
 0x4c0   :  { %851 = vsyncpa [#allocation13], 1 }
 0x4c1   :  { %852 = vsyncpa [#allocation5], 1 }

</bundles_post_ra>
